<compile_context>
chip_gen: v7x
topology: tpu7x:2x2x1
jax: 0.10.0
libtpu: 0.0.40
codegen_flags: <defaults>
</compile_context>

<pallas_src>
import functools

import jax
import jax.numpy as jnp
from jax.experimental import pallas as pl
from jax.experimental.pallas import tpu as pltpu


def fused_rnn_kernel(x_ref,      # (T*B, I)  time-major input, flattened over (T, B)
                     wih0_ref,   # (I, H)    layer-0 input weight, transposed
                     whh0_ref,   # (H, H)    layer-0 hidden weight, transposed
                     b0_ref,     # (1, H)    layer-0 combined bias (b_ih + b_hh)
                     w1_ref,     # (2H, H)   concat([Wih1^T, Whh1^T], axis=0)
                     b1_ref,     # (1, H)    layer-1 combined bias
                     wfc_ref,    # (H, 32)   fc weight, transposed
                     bfc_ref,    # (1, 32)   fc bias
                     out_ref,    # (B, 32)   final output
                     *, T, B):
    H = whh0_ref.shape[0]

    # ---- hoisted layer-0 input projection (one matmul, bias folded in) ----
    # This runs off the serial recurrence; the hot loop below only sees the
    # recurrent terms.
    xproj = (jnp.dot(x_ref[...], wih0_ref[...],
                     preferred_element_type=jnp.float32)
             + b0_ref[...])                                  # (T*B, H)

    whh0 = whh0_ref[...]
    w1 = w1_ref[...]
    b1 = jnp.broadcast_to(b1_ref[...], (B, H))               # hoisted broadcast

    h0 = jnp.zeros((B, H), jnp.float32)
    h1 = jnp.zeros((B, H), jnp.float32)

    # ---- fused 2-layer recurrence, fully unrolled (T is static & small) ---
    # h0_t = tanh(xproj_t + h0_{t-1} @ Whh0^T)
    # h1_t = tanh([h0_t, h1_{t-1}] @ [Wih1^T; Whh1^T] + b1)
    for t in range(T):
        xp_t = xproj[t * B:(t + 1) * B, :]                   # (B, H) static slice
        h0 = jnp.tanh(
            xp_t + jnp.dot(h0, whh0, preferred_element_type=jnp.float32))
        h1 = jnp.tanh(
            jnp.dot(jnp.concatenate([h0, h1], axis=-1), w1,
                    preferred_element_type=jnp.float32) + b1)

    # ---- fc on the last timestep of the top layer -------------------------
    out_ref[...] = (jnp.dot(h1, wfc_ref[...],
                            preferred_element_type=jnp.float32)
                    + bfc_ref[...])


def prepare_params(p):
    """One-time layout plumbing (transposes / concat / bias sums / reshapes)
    so the per-call wrapper launches the kernel with zero extra XLA ops."""
    H = p["whh0"].shape[0]
    return {
        "wih0_t": jnp.asarray(p["wih0"].T),                              # (I, H)
        "whh0_t": jnp.asarray(p["whh0"].T),                              # (H, H)
        "b0": (p["bih0"] + p["bhh0"]).reshape(1, H),                     # (1, H)
        "w1cat": jnp.concatenate([p["wih1"].T, p["whh1"].T], axis=0),    # (2H, H)
        "b1": (p["bih1"] + p["bhh1"]).reshape(1, H),                     # (1, H)
        "wfc_t": jnp.asarray(p["wfc"].T),                                # (H, 32)
        "bfc": p["bfc"].reshape(1, 32),                                  # (1, 32)
    }


def simple_rnn_forward(x, prepared):
    """x: (B, T, I) float32, batch_first like the PyTorch module."""
    B, T, I = x.shape
    H = prepared["whh0_t"].shape[1]
    # time-major + flattened over (T, B): one slab for the hoisted projection.
    x_tm = jnp.transpose(x, (1, 0, 2)).reshape(T * B, I)

    vmem = pl.BlockSpec(memory_space=pltpu.MemorySpace.VMEM)
    kernel = functools.partial(fused_rnn_kernel, T=T, B=B)
    # TODO(synk): for large B, add grid=(B//Bt,) with dimension_semantics=
    # ("parallel",) so v7x's two TensorCores each run an independent batch slice.
    return pl.pallas_call(
        kernel,
        out_shape=jax.ShapeDtypeStruct((B, 32), jnp.float32),
        in_specs=[vmem] * 8,
        out_specs=vmem,
    )(
        x_tm,
        prepared["wih0_t"], prepared["whh0_t"], prepared["b0"],
        prepared["w1cat"], prepared["b1"],
        prepared["wfc_t"], prepared["bfc"],
    )


def init_params(key, input_size, hidden_size):
    """Deterministic init mirroring PyTorch's default uniform(-1/sqrt(H), 1/sqrt(H))."""
    ks = jax.random.split(key, 10)
    bound = 1.0 / jnp.sqrt(hidden_size)
    u = lambda k, shape: jax.random.uniform(k, shape, jnp.float32, -bound, bound)
    return {
        "wih0": u(ks[0], (hidden_size, input_size)),
        "whh0": u(ks[1], (hidden_size, hidden_size)),
        "bih0": u(ks[2], (hidden_size,)),
        "bhh0": u(ks[3], (hidden_size,)),
        "wih1": u(ks[4], (hidden_size, hidden_size)),
        "whh1": u(ks[5], (hidden_size, hidden_size)),
        "bih1": u(ks[6], (hidden_size,)),
        "bhh1": u(ks[7], (hidden_size,)),
        "wfc": u(ks[8], (32, hidden_size)),
        "bfc": u(ks[9], (32,)),
    }


def reference_forward(x, p):
    """Pure-JAX reference matching PyTorch nn.RNN(tanh, 2 layers) + Linear."""
    B, T, _ = x.shape
    H = p["whh0"].shape[0]
    h0 = jnp.zeros((B, H), jnp.float32)
    seq = []
    for t in range(T):
        h0 = jnp.tanh(x[:, t, :] @ p["wih0"].T + p["bih0"]
                      + h0 @ p["whh0"].T + p["bhh0"])
        seq.append(h0)
    h1 = jnp.zeros((B, H), jnp.float32)
    for t in range(T):
        h1 = jnp.tanh(seq[t] @ p["wih1"].T + p["bih1"]
                      + h1 @ p["whh1"].T + p["bhh1"])
    return h1 @ p["wfc"].T + p["bfc"]


if __name__ == "__main__":
    input_size, hidden_size, num_layers = 16, 32, 2
    batch, seq_len = 2, 8

    key = jax.random.PRNGKey(0)
    k_x, k_p = jax.random.split(key)
    x = jax.random.normal(k_x, (batch, seq_len, input_size), jnp.float32)
    params = init_params(k_p, input_size, hidden_size)

    prepared = prepare_params(params)          # one-time weight prep
    fwd = jax.jit(simple_rnn_forward)

    out = fwd(x, prepared)
    out = jax.block_until_ready(out)

    ref = reference_forward(x, params)
    assert out.shape == (batch, 32)
    assert jnp.allclose(out, ref, atol=2e-5, rtol=2e-5), "mismatch vs reference"
    print("KERNEL_OK")
</pallas_src>

<mosaic_0001>
module attributes {stable_mosaic.version = 11 : i64} {
  func.func @fused_rnn_kernel(%arg0: memref<16x16xf32, #tpu.memory_space<vmem>>, %arg1: memref<16x32xf32, #tpu.memory_space<vmem>>, %arg2: memref<32x32xf32, #tpu.memory_space<vmem>>, %arg3: memref<1x32xf32, #tpu.memory_space<vmem>>, %arg4: memref<64x32xf32, #tpu.memory_space<vmem>>, %arg5: memref<1x32xf32, #tpu.memory_space<vmem>>, %arg6: memref<32x32xf32, #tpu.memory_space<vmem>>, %arg7: memref<1x32xf32, #tpu.memory_space<vmem>>, %arg8: memref<2x32xf32, #tpu.memory_space<vmem>>) attributes {dimension_semantics = [], scalar_prefetch = 0 : i64, scratch_operands = 0 : i64, tpu.core_type = #tpu.core_type<tc>} {
    %c0 = arith.constant 0 : index
    %c0_0 = arith.constant 0 : index
    %0 = vector.load %arg0[%c0, %c0_0] : memref<16x16xf32, #tpu.memory_space<vmem>>, vector<16x16xf32>
    %c0_1 = arith.constant 0 : index
    %c0_2 = arith.constant 0 : index
    %1 = vector.load %arg1[%c0_1, %c0_2] : memref<16x32xf32, #tpu.memory_space<vmem>>, vector<16x32xf32>
    %cst = arith.constant dense<0.000000e+00> : vector<16x32xf32>
    %2 = tpu.matmul %0, %1, %cst {dimension_numbers = #tpu.dot_dimension_numbers<[1], [0], [0], [1], [0, 0, 1, 1], [], []>} : vector<16x16xf32>, vector<16x32xf32>, vector<16x32xf32> -> vector<16x32xf32>
    %c0_3 = arith.constant 0 : index
    %c0_4 = arith.constant 0 : index
    %3 = vector.load %arg3[%c0_3, %c0_4] : memref<1x32xf32, #tpu.memory_space<vmem>>, vector<1x32xf32>
    %4 = vector.broadcast %3 : vector<1x32xf32> to vector<16x32xf32>
    %5 = arith.addf %2, %4 : vector<16x32xf32>
    %c0_5 = arith.constant 0 : index
    %c0_6 = arith.constant 0 : index
    %6 = vector.load %arg2[%c0_5, %c0_6] : memref<32x32xf32, #tpu.memory_space<vmem>>, vector<32x32xf32>
    %c0_7 = arith.constant 0 : index
    %c0_8 = arith.constant 0 : index
    %7 = vector.load %arg4[%c0_7, %c0_8] : memref<64x32xf32, #tpu.memory_space<vmem>>, vector<64x32xf32>
    %c0_9 = arith.constant 0 : index
    %c0_10 = arith.constant 0 : index
    %8 = vector.load %arg5[%c0_9, %c0_10] : memref<1x32xf32, #tpu.memory_space<vmem>>, vector<1x32xf32>
    %9 = vector.shape_cast %8 : vector<1x32xf32> to vector<1x32xf32>
    %10 = vector.broadcast %9 : vector<1x32xf32> to vector<2x32xf32>
    %cst_11 = arith.constant 0.000000e+00 : f32
    %11 = vector.broadcast %cst_11 : f32 to vector<2x32xf32>
    %cst_12 = arith.constant 0.000000e+00 : f32
    %12 = vector.broadcast %cst_12 : f32 to vector<2x32xf32>
    %13 = vector.extract_strided_slice %5 {offsets = [0, 0], sizes = [2, 32], strides = [1, 1]} : vector<16x32xf32> to vector<2x32xf32>
    %cst_13 = arith.constant dense<0.000000e+00> : vector<2x32xf32>
    %14 = tpu.matmul %11, %6, %cst_13 {dimension_numbers = #tpu.dot_dimension_numbers<[1], [0], [0], [1], [0, 0, 1, 1], [], []>} : vector<2x32xf32>, vector<32x32xf32>, vector<2x32xf32> -> vector<2x32xf32>
    %15 = arith.addf %13, %14 : vector<2x32xf32>
    %16 = math.tanh %15 : vector<2x32xf32>
    %17 = tpu.concatenate %16, %12 in 1 : vector<2x32xf32>, vector<2x32xf32> -> vector<2x64xf32>
    %cst_14 = arith.constant dense<0.000000e+00> : vector<2x32xf32>
    %18 = tpu.matmul %17, %7, %cst_14 {dimension_numbers = #tpu.dot_dimension_numbers<[1], [0], [0], [1], [0, 0, 1, 1], [], []>} : vector<2x64xf32>, vector<64x32xf32>, vector<2x32xf32> -> vector<2x32xf32>
    %19 = arith.addf %18, %10 : vector<2x32xf32>
    %20 = math.tanh %19 : vector<2x32xf32>
    %21 = vector.extract_strided_slice %5 {offsets = [2, 0], sizes = [2, 32], strides = [1, 1]} : vector<16x32xf32> to vector<2x32xf32>
    %cst_15 = arith.constant dense<0.000000e+00> : vector<2x32xf32>
    %22 = tpu.matmul %16, %6, %cst_15 {dimension_numbers = #tpu.dot_dimension_numbers<[1], [0], [0], [1], [0, 0, 1, 1], [], []>} : vector<2x32xf32>, vector<32x32xf32>, vector<2x32xf32> -> vector<2x32xf32>
    %23 = arith.addf %21, %22 : vector<2x32xf32>
    %24 = math.tanh %23 : vector<2x32xf32>
    %25 = tpu.concatenate %24, %20 in 1 : vector<2x32xf32>, vector<2x32xf32> -> vector<2x64xf32>
    %cst_16 = arith.constant dense<0.000000e+00> : vector<2x32xf32>
    %26 = tpu.matmul %25, %7, %cst_16 {dimension_numbers = #tpu.dot_dimension_numbers<[1], [0], [0], [1], [0, 0, 1, 1], [], []>} : vector<2x64xf32>, vector<64x32xf32>, vector<2x32xf32> -> vector<2x32xf32>
    %27 = arith.addf %26, %10 : vector<2x32xf32>
    %28 = math.tanh %27 : vector<2x32xf32>
    %29 = vector.extract_strided_slice %5 {offsets = [4, 0], sizes = [2, 32], strides = [1, 1]} : vector<16x32xf32> to vector<2x32xf32>
    %cst_17 = arith.constant dense<0.000000e+00> : vector<2x32xf32>
    %30 = tpu.matmul %24, %6, %cst_17 {dimension_numbers = #tpu.dot_dimension_numbers<[1], [0], [0], [1], [0, 0, 1, 1], [], []>} : vector<2x32xf32>, vector<32x32xf32>, vector<2x32xf32> -> vector<2x32xf32>
    %31 = arith.addf %29, %30 : vector<2x32xf32>
    %32 = math.tanh %31 : vector<2x32xf32>
    %33 = tpu.concatenate %32, %28 in 1 : vector<2x32xf32>, vector<2x32xf32> -> vector<2x64xf32>
    %cst_18 = arith.constant dense<0.000000e+00> : vector<2x32xf32>
    %34 = tpu.matmul %33, %7, %cst_18 {dimension_numbers = #tpu.dot_dimension_numbers<[1], [0], [0], [1], [0, 0, 1, 1], [], []>} : vector<2x64xf32>, vector<64x32xf32>, vector<2x32xf32> -> vector<2x32xf32>
    %35 = arith.addf %34, %10 : vector<2x32xf32>
    %36 = math.tanh %35 : vector<2x32xf32>
    %37 = vector.extract_strided_slice %5 {offsets = [6, 0], sizes = [2, 32], strides = [1, 1]} : vector<16x32xf32> to vector<2x32xf32>
    %cst_19 = arith.constant dense<0.000000e+00> : vector<2x32xf32>
    %38 = tpu.matmul %32, %6, %cst_19 {dimension_numbers = #tpu.dot_dimension_numbers<[1], [0], [0], [1], [0, 0, 1, 1], [], []>} : vector<2x32xf32>, vector<32x32xf32>, vector<2x32xf32> -> vector<2x32xf32>
    %39 = arith.addf %37, %38 : vector<2x32xf32>
    %40 = math.tanh %39 : vector<2x32xf32>
    %41 = tpu.concatenate %40, %36 in 1 : vector<2x32xf32>, vector<2x32xf32> -> vector<2x64xf32>
    %cst_20 = arith.constant dense<0.000000e+00> : vector<2x32xf32>
    %42 = tpu.matmul %41, %7, %cst_20 {dimension_numbers = #tpu.dot_dimension_numbers<[1], [0], [0], [1], [0, 0, 1, 1], [], []>} : vector<2x64xf32>, vector<64x32xf32>, vector<2x32xf32> -> vector<2x32xf32>
    %43 = arith.addf %42, %10 : vector<2x32xf32>
    %44 = math.tanh %43 : vector<2x32xf32>
    %45 = vector.extract_strided_slice %5 {offsets = [8, 0], sizes = [2, 32], strides = [1, 1]} : vector<16x32xf32> to vector<2x32xf32>
    %cst_21 = arith.constant dense<0.000000e+00> : vector<2x32xf32>
    %46 = tpu.matmul %40, %6, %cst_21 {dimension_numbers = #tpu.dot_dimension_numbers<[1], [0], [0], [1], [0, 0, 1, 1], [], []>} : vector<2x32xf32>, vector<32x32xf32>, vector<2x32xf32> -> vector<2x32xf32>
    %47 = arith.addf %45, %46 : vector<2x32xf32>
    %48 = math.tanh %47 : vector<2x32xf32>
    %49 = tpu.concatenate %48, %44 in 1 : vector<2x32xf32>, vector<2x32xf32> -> vector<2x64xf32>
    %cst_22 = arith.constant dense<0.000000e+00> : vector<2x32xf32>
    %50 = tpu.matmul %49, %7, %cst_22 {dimension_numbers = #tpu.dot_dimension_numbers<[1], [0], [0], [1], [0, 0, 1, 1], [], []>} : vector<2x64xf32>, vector<64x32xf32>, vector<2x32xf32> -> vector<2x32xf32>
    %51 = arith.addf %50, %10 : vector<2x32xf32>
    %52 = math.tanh %51 : vector<2x32xf32>
    %53 = vector.extract_strided_slice %5 {offsets = [10, 0], sizes = [2, 32], strides = [1, 1]} : vector<16x32xf32> to vector<2x32xf32>
    %cst_23 = arith.constant dense<0.000000e+00> : vector<2x32xf32>
    %54 = tpu.matmul %48, %6, %cst_23 {dimension_numbers = #tpu.dot_dimension_numbers<[1], [0], [0], [1], [0, 0, 1, 1], [], []>} : vector<2x32xf32>, vector<32x32xf32>, vector<2x32xf32> -> vector<2x32xf32>
    %55 = arith.addf %53, %54 : vector<2x32xf32>
    %56 = math.tanh %55 : vector<2x32xf32>
    %57 = tpu.concatenate %56, %52 in 1 : vector<2x32xf32>, vector<2x32xf32> -> vector<2x64xf32>
    %cst_24 = arith.constant dense<0.000000e+00> : vector<2x32xf32>
    %58 = tpu.matmul %57, %7, %cst_24 {dimension_numbers = #tpu.dot_dimension_numbers<[1], [0], [0], [1], [0, 0, 1, 1], [], []>} : vector<2x64xf32>, vector<64x32xf32>, vector<2x32xf32> -> vector<2x32xf32>
    %59 = arith.addf %58, %10 : vector<2x32xf32>
    %60 = math.tanh %59 : vector<2x32xf32>
    %61 = vector.extract_strided_slice %5 {offsets = [12, 0], sizes = [2, 32], strides = [1, 1]} : vector<16x32xf32> to vector<2x32xf32>
    %cst_25 = arith.constant dense<0.000000e+00> : vector<2x32xf32>
    %62 = tpu.matmul %56, %6, %cst_25 {dimension_numbers = #tpu.dot_dimension_numbers<[1], [0], [0], [1], [0, 0, 1, 1], [], []>} : vector<2x32xf32>, vector<32x32xf32>, vector<2x32xf32> -> vector<2x32xf32>
    %63 = arith.addf %61, %62 : vector<2x32xf32>
    %64 = math.tanh %63 : vector<2x32xf32>
    %65 = tpu.concatenate %64, %60 in 1 : vector<2x32xf32>, vector<2x32xf32> -> vector<2x64xf32>
    %cst_26 = arith.constant dense<0.000000e+00> : vector<2x32xf32>
    %66 = tpu.matmul %65, %7, %cst_26 {dimension_numbers = #tpu.dot_dimension_numbers<[1], [0], [0], [1], [0, 0, 1, 1], [], []>} : vector<2x64xf32>, vector<64x32xf32>, vector<2x32xf32> -> vector<2x32xf32>
    %67 = arith.addf %66, %10 : vector<2x32xf32>
    %68 = math.tanh %67 : vector<2x32xf32>
    %69 = vector.extract_strided_slice %5 {offsets = [14, 0], sizes = [2, 32], strides = [1, 1]} : vector<16x32xf32> to vector<2x32xf32>
    %cst_27 = arith.constant dense<0.000000e+00> : vector<2x32xf32>
    %70 = tpu.matmul %64, %6, %cst_27 {dimension_numbers = #tpu.dot_dimension_numbers<[1], [0], [0], [1], [0, 0, 1, 1], [], []>} : vector<2x32xf32>, vector<32x32xf32>, vector<2x32xf32> -> vector<2x32xf32>
    %71 = arith.addf %69, %70 : vector<2x32xf32>
    %72 = math.tanh %71 : vector<2x32xf32>
    %73 = tpu.concatenate %72, %68 in 1 : vector<2x32xf32>, vector<2x32xf32> -> vector<2x64xf32>
    %cst_28 = arith.constant dense<0.000000e+00> : vector<2x32xf32>
    %74 = tpu.matmul %73, %7, %cst_28 {dimension_numbers = #tpu.dot_dimension_numbers<[1], [0], [0], [1], [0, 0, 1, 1], [], []>} : vector<2x64xf32>, vector<64x32xf32>, vector<2x32xf32> -> vector<2x32xf32>
    %75 = arith.addf %74, %10 : vector<2x32xf32>
    %76 = math.tanh %75 : vector<2x32xf32>
    %c0_29 = arith.constant 0 : index
    %c0_30 = arith.constant 0 : index
    %77 = vector.load %arg6[%c0_29, %c0_30] : memref<32x32xf32, #tpu.memory_space<vmem>>, vector<32x32xf32>
    %cst_31 = arith.constant dense<0.000000e+00> : vector<2x32xf32>
    %78 = tpu.matmul %76, %77, %cst_31 {dimension_numbers = #tpu.dot_dimension_numbers<[1], [0], [0], [1], [0, 0, 1, 1], [], []>} : vector<2x32xf32>, vector<32x32xf32>, vector<2x32xf32> -> vector<2x32xf32>
    %c0_32 = arith.constant 0 : index
    %c0_33 = arith.constant 0 : index
    %79 = vector.load %arg7[%c0_32, %c0_33] : memref<1x32xf32, #tpu.memory_space<vmem>>, vector<1x32xf32>
    %80 = vector.broadcast %79 : vector<1x32xf32> to vector<2x32xf32>
    %81 = arith.addf %78, %80 : vector<2x32xf32>
    %c0_34 = arith.constant 0 : index
    %c0_35 = arith.constant 0 : index
    %82 = vector.load %arg8[%c0_34, %c0_35] : memref<2x32xf32, #tpu.memory_space<vmem>>, vector<2x32xf32>
    tpu.vector_store %arg8[%c0_34, %c0_35], %81 {strides = array<i32>} : memref<2x32xf32, #tpu.memory_space<vmem>>, vector<2x32xf32>,
    return
  }
}

</mosaic_0001>

<bundles_post_ra>
// kernel: simple_rnn_forward.1
= control target key start
LH: loop header
LB: loop body
LE: loop exit
PB: predicated region body
PF: predicated region fallthrough
CT: control target
= control target key end

     0   :  { %vm41_vm0 = vcmask 130048   ;;  %v2122_v3 = vmov 0.0|0.0   ;;  %vm2123_vm1 = vmmov 0   ;;  %v2124_v10 = vmov 0.0   ;;  %s2453_s0 = inlined_call_operand.vmem [shape: f32[16,16], index: 0, kind: input, shape index: {}]   ;;  %s2454_s1 = inlined_call_operand.vmem [shape: f32[16,32], index: 1, kind: input, shape index: {}]   ;;  %s2455_s2 = inlined_call_operand.vmem [shape: f32[32,32], index: 2, kind: input, shape index: {}]   ;;  %s2456_s3 = inlined_call_operand.vmem [shape: f32[1,32], index: 3, kind: input, shape index: {}]   ;;  %s2457_s4 = inlined_call_operand.vmem [shape: f32[64,32], index: 4, kind: input, shape index: {}]   ;;  %s2458_s5 = inlined_call_operand.vmem [shape: f32[1,32], index: 5, kind: input, shape index: {}]   ;;  %s2459_s6 = inlined_call_operand.vmem [shape: f32[32,32], index: 6, kind: input, shape index: {}]   ;;  %s2460_s7 = inlined_call_operand.vmem [shape: f32[1,32], index: 7, kind: input, shape index: {}]   ;;  %s2461_s8 = inlined_call_operand.hbm [shape: f32[2,32], index: 8, kind: output, shape index: {}]  }
   0x1   :  { %v32_v0 = vld [vmem:[%s2454_s1] sm:$0xff]  ;;  %v33_v1 = vld [vmem:[%s2454_s1 + $0x8] sm:$0xff]  ;;  %1911 = vmatprep.subr.bf16.mxu1 %v2122_v3  ;;  %v125_v8 = vld [vmem:[%s2455_s2 + $0x10] sm:$0xff]  ;;  %1664 = vmatprep.mubr.msk.f32.mxu1 %vm2123_vm1, %v2124_v10 }
   0x2   :  { %v123_v2 = vld [vmem:[%s2455_s2] sm:$0xff]  ;;  %v1907_v4 = vpack.c.bf16 %v33_v1, %v32_v0  ;;  %v124_v5 = vld [vmem:[%s2455_s2 + $0x8] sm:$0xff]  ;;  %v126_v9 = vld [vmem:[%s2455_s2 + $0x18] sm:$0xff] }
   0x3   :  { %v30_v6 = vld [vmem:[%s2453_s0] sm:$0xff]  ;;  %v2188_v7 = vpack.c.bf16 %v124_v5, %v123_v2 }
   0x4   :  { %1653 = vmatprep.mubr.msk.f32.mxu0 %vm41_vm0, %v30_v6 }
   0x5   :  { %13 = vsyncpa [#allocation3], 0  ;;  %1908 = vmatprep.subr.bf16.mxu0 %v1907_v4  ;;  %1913 = vmatpush3.bf16.msra.mxu1 %v2188_v7  ;;  %v31_v11 = vld [vmem:[%s2453_s0 + $0x8] sm:$0xff]  ;;  %v2203_v12 = vpack.c.bf16 %v126_v9, %v125_v8  ;;  %v127_v13 = vld [vmem:[%s2457_s4] sm:$0xff]  ;;  %vm142_vm2 = vcmask 261120   ;;  %vm219_vm3 = vcmask 523264  }
   0x6   :  { %1910 = vmatpush3.bf16.msra.mxu0 %v1907_v4  ;;  %1914 = vmatprep.subr.bf16.mxu1 %v2122_v3  ;;  %v128_v14 = vld [vmem:[%s2457_s4 + $0x8] sm:$0xff]  ;;  %v129_v16 = vld [vmem:[%s2457_s4 + $0x10] sm:$0xff]  ;;  %v130_v17 = vld [vmem:[%s2457_s4 + $0x18] sm:$0xff]  ;;  %s2125_s14 = smov 32   ;;  %s2126_s21 = smov [#allocation2]   ;;  %vm1491_vm4 = vcmask 254976  }
   0x7   :  { %1917 = vmatprep.subr.bf16.mxu0 %v2122_v3  ;;  %v2225_v15 = vpack.c.bf16 %v128_v14, %v127_v13  ;;  %v2235_v18 = vpack.c.bf16 %v130_v17, %v129_v16  ;;  %v131_v19 = vld [vmem:[%s2457_s4 + $0x20] sm:$0xff]  ;;  %v132_v20 = vld [vmem:[%s2457_s4 + $0x28] sm:$0xff]  ;;  %v133_v22 = vld [vmem:[%s2457_s4 + $0x30] sm:$0xff]  ;;  %s1499_s22 = sshll.u32 %s2126_s21, 4  ;;  %s1500_s22 = int_to_ptr.vmem [resolvable:$true] %s1499_s22 }
   0x8   :  { %v2244_v21 = vpack.c.bf16 %v132_v20, %v131_v19  ;;  %v134_v23 = vld [vmem:[%s2457_s4 + $0x38] sm:$0xff]  ;;  %v1507_v25 = vld [vmem:[%s2456_s3] ss:$0 sm:$0xff]  ;;  %p2103_p1 = scmp.lt.s32.totalorder %s1500_s22, %s1500_s22 }
   0x9   :  { %1654 = vmatmul.mubr.msk.f32.vlgmr.msra.gmra.mrb[0].mxu0 %vm41_vm0, %v31_v11  ;;  %1916 = vmatpush3.bf16.msra.mxu1 %v2203_v12  ;;  %v2254_v24 = vpack.c.bf16 %v134_v23, %v133_v22  ;;  %v2289_v35 = vld [vmem:[%s2458_s5] ss:$0 sm:$0xff] }
   0xa   :  { %1683 = vmatprep.mubr.msk.f32.mxu0 %vm2123_vm1, %v2124_v10  ;;  %1929 = vmatprep.subr.bf16.mxu1 %v2122_v3 }
   0xb   :  { %1919 = vmatpush3.bf16.msra.mxu0 %v2225_v15 }
   0xc   :  { %1665 = vmatmul.mubr.f32.vlgmr.msra.gmra.mrb[0].mxu1 %v2124_v10  ;;  %1920 = vmatprep.subr.bf16.mxu0 %v2122_v3 }
   0xd   :  { %1931 = vmatpush3.bf16.msra.mxu1 %v2188_v7  ;;  %1694 = vmatprep.mubr.msk.f32.mxu1 %vm2123_vm1, %v2124_v10 }
   0xe   :  { %1932 = vmatprep.subr.bf16.mxu1 %v2122_v3 }
   0xf   :  { %1922 = vmatpush3.bf16.msra.mxu0 %v2235_v18 }
  0x10   :  { %1923 = vmatprep.subr.bf16.mxu0 %v2122_v3 }
  0x11   :  { %1934 = vmatpush3.bf16.msra.mxu1 %v2203_v12 }
  0x12   :  { %1935 = vmatprep.subr.bf16.mxu1 %v2122_v3 }
  0x13   :  { %1925 = vmatpush3.bf16.msra.mxu0 %v2244_v21 }
  0x14   :  { %1926 = vmatprep.subr.bf16.mxu0 %v2122_v3 }
  0x17   :  { %1928 = vmatpush3.bf16.msra.mxu0 %v2254_v24 }
  0x18   :  { %1947 = vmatprep.subr.bf16.mxu0 %v2122_v3 }
  0xdc   :  { %v1655_v26 = vpop.f32.mrb[0].mxu0 }
  0xdd   :  { %v2262_v27 = vadd.f32 %v1655_v26, %v1507_v25  ;;  %v114_v28 = vpop.f32.mrb[1].mxu0 }
  0xde   :  { %v2264_v29 = vadd.f32 %v1507_v25, %v114_v28 }
  0xdf   :  { %v212_v30 = vpop.f32.mrb[0].mxu1 }
  0xe0   :  { %v216_v31 = vadd.f32 %v212_v30, %v2264_v29  ;;  %v1666_v32 = vpop.f32.mrb[1].mxu1 }
  0xe2   :  { %2066 = vtanh.f32 %v216_v31 }
  0xec   :  { %v2067_v33 = vpop.eup %2066 }
  0xed   :  { %1695 = vmatmul.mubr.msk.f32.vlgmr.msra.gmra.mrb[2].mxu1 %vm142_vm2, %v2067_v33  ;;  %v218_v34 = vsel %vm142_vm2, %v2067_v33, 0.0 }
  0xee   :  { %1684 = vmatmul.mubr.msk.f32.vlgmr.msra.gmra.mrb[2].mxu0 %vm219_vm3, %v218_v34  ;;  %1937 = vmatpush3.bf16.msra.mxu1 %v2225_v15 }
  0xef   :  { %1949 = vmatpush3.bf16.msra.mxu0 %v2188_v7  ;;  %1724 = vmatprep.mubr.msk.f32.mxu0 %vm2123_vm1, %v2124_v10 }
  0xf0   :  { %1950 = vmatprep.subr.bf16.mxu0 %v2122_v3  ;;  %1938 = vmatprep.subr.bf16.mxu1 %v2122_v3 }
  0xf1   :  { %1713 = vmatprep.mubr.msk.f32.mxu1 %vm2123_vm1, %v2124_v10 }
  0xf2   :  { %1940 = vmatpush3.bf16.msra.mxu1 %v2235_v18 }
  0xf3   :  { %1952 = vmatpush3.bf16.msra.mxu0 %v2203_v12  ;;  %1941 = vmatprep.subr.bf16.mxu1 %v2122_v3 }
  0xf4   :  { %1953 = vmatprep.subr.bf16.mxu0 %v2122_v3 }
  0xf6   :  { %1943 = vmatpush3.bf16.msra.mxu1 %v2244_v21 }
  0xf7   :  { %1944 = vmatprep.subr.bf16.mxu1 %v2122_v3 }
  0xfa   :  { %1946 = vmatpush3.bf16.msra.mxu1 %v2254_v24 }
  0xfb   :  { %1965 = vmatprep.subr.bf16.mxu1 %v2122_v3 }
 0x1c0   :  { %v363_v36 = vpop.f32.mrb[2].mxu1 }
 0x1c1   :  { %v368_v37 = vrot.slane %v363_v36, 6  ;;  %v289_v38 = vpop.f32.mrb[2].mxu0  ;;  %v1696_v39 = vpop.f32.mrb[3].mxu1 }
 0x1c2   :  { %v290_v40 = vadd.f32 %v2289_v35, %v289_v38  ;;  %v1685_v41 = vpop.f32.mrb[3].mxu0 }
 0x1c3   :  { %v370_v42 = vadd.f32 %v368_v37, %v2264_v29 }
 0x1c4   :  { %2068 = vtanh.f32 %v290_v40 }
 0x1c5   :  { %2070 = vtanh.f32 %v370_v42 }
 0x1ce   :  { %v2069_v43 = vpop.eup %2068 }
 0x1cf   :  { %v2071_v44 = vpop.eup %2070  ;;  %v373_v45 = vrot.slane %v2069_v43, 6 }
 0x1d0   :  { %v454_v46 = vrot.slane %v2071_v44, 2 }
 0x1d1   :  { %374 = vrot.lane.b32.xlu0 %v373_v45, %s2125_s14 }
 0x1d2   :  { %1725 = vmatmul.mubr.msk.f32.vlgmr.msra.gmra.mrb[4].mxu0 %vm142_vm2, %v454_v46 }
 0x1d3   :  { %1955 = vmatpush3.bf16.msra.mxu0 %v2225_v15  ;;  %1743 = vmatprep.mubr.msk.f32.mxu0 %vm2123_vm1, %v2124_v10 }
 0x1d4   :  { %1956 = vmatprep.subr.bf16.mxu0 %v2122_v3 }
 0x1d7   :  { %1958 = vmatpush3.bf16.msra.mxu0 %v2235_v18 }
 0x1d8   :  { %1959 = vmatprep.subr.bf16.mxu0 %v2122_v3 }
 0x1db   :  { %1961 = vmatpush3.bf16.msra.mxu0 %v2244_v21 }
 0x1dc   :  { %1962 = vmatprep.subr.bf16.mxu0 %v2122_v3 }
 0x1df   :  { %1964 = vmatpush3.bf16.msra.mxu0 %v2254_v24 }
 0x1e0   :  { %1983 = vmatprep.subr.bf16.mxu0 %v2122_v3 }
 0x243   :  { %v375_v47 = vpop.permute.xlu0 %374 }
 0x244   :  { %v377_v48 = vsel %vm142_vm2, %v2071_v44, %v375_v47 }
 0x245   :  { %v379_v49 = vrot.slane %v377_v48, 2 }
 0x247   :  { %1714 = vmatmul.mubr.msk.f32.vlgmr.msra.gmra.mrb[4].mxu1 %vm219_vm3, %v379_v49 }
 0x248   :  { %1967 = vmatpush3.bf16.msra.mxu1 %v2188_v7  ;;  %1754 = vmatprep.mubr.msk.f32.mxu1 %vm2123_vm1, %v2124_v10 }
 0x249   :  { %1968 = vmatprep.subr.bf16.mxu1 %v2122_v3 }
 0x24c   :  { %1970 = vmatpush3.bf16.msra.mxu1 %v2203_v12 }
 0x24d   :  { %1971 = vmatprep.subr.bf16.mxu1 %v2122_v3 }
 0x2a5   :  { %v523_v50 = vpop.f32.mrb[4].mxu0 }
 0x2a6   :  { %v528_v51 = vrot.slane %v523_v50, 4  ;;  %v1726_v52 = vpop.f32.mrb[5].mxu0 }
 0x2a8   :  { %v530_v53 = vadd.f32 %v528_v51, %v2264_v29 }
 0x2aa   :  { %2072 = vtanh.f32 %v530_v53 }
 0x2b4   :  { %v2073_v54 = vpop.eup %2072 }
 0x2b5   :  { %v614_v55 = vrot.slane %v2073_v54, 4 }
 0x2b7   :  { %1755 = vmatmul.mubr.msk.f32.vlgmr.msra.gmra.mrb[6].mxu1 %vm142_vm2, %v614_v55 }
 0x2b8   :  { %1973 = vmatpush3.bf16.msra.mxu1 %v2225_v15  ;;  %1773 = vmatprep.mubr.msk.f32.mxu1 %vm2123_vm1, %v2124_v10 }
 0x2b9   :  { %1974 = vmatprep.subr.bf16.mxu1 %v2122_v3 }
 0x2bc   :  { %1976 = vmatpush3.bf16.msra.mxu1 %v2235_v18 }
 0x2bd   :  { %1977 = vmatprep.subr.bf16.mxu1 %v2122_v3 }
 0x2c0   :  { %1979 = vmatpush3.bf16.msra.mxu1 %v2244_v21 }
 0x2c1   :  { %1980 = vmatprep.subr.bf16.mxu1 %v2122_v3 }
 0x2c4   :  { %1982 = vmatpush3.bf16.msra.mxu1 %v2254_v24 }
 0x2c5   :  { %2001 = vmatprep.subr.bf16.mxu1 %v2122_v3 }
 0x31a   :  { %v448_v56 = vpop.f32.mrb[4].mxu1 }
 0x31b   :  { %v449_v57 = vadd.f32 %v2289_v35, %v448_v56  ;;  %v1715_v58 = vpop.f32.mrb[5].mxu1 }
 0x31d   :  { %2074 = vtanh.f32 %v449_v57 }
 0x327   :  { %v2075_v59 = vpop.eup %2074 }
 0x328   :  { %v533_v60 = vrot.slane %v2075_v59, 4 }
 0x32a   :  { %534 = vrot.lane.b32.xlu0 %v533_v60, %s2125_s14 }
 0x38a   :  { %v683_v61 = vpop.f32.mrb[6].mxu1 }
 0x38b   :  { %v1756_v62 = vpop.f32.mrb[7].mxu1  ;;  %v688_v63 = vrot.slane %v683_v61, 2 }
 0x38d   :  { %v690_v0 = vadd.f32 %v688_v63, %v2264_v29 }
 0x38f   :  { %2076 = vtanh.f32 %v690_v0 }
 0x399   :  { %v2077_v5 = vpop.eup %2076 }
 0x39a   :  { %v774_v6 = vrot.slane %v2077_v5, 6 }
 0x39c   :  { %v535_v1 = vpop.permute.xlu0 %534 }
 0x39d   :  { %v537_v2 = vsel %vm142_vm2, %v2073_v54, %v535_v1 }
 0x39e   :  { %v539_v4 = vrot.slane %v537_v2, 4 }
 0x3a0   :  { %1744 = vmatmul.mubr.msk.f32.vlgmr.msra.gmra.mrb[6].mxu0 %vm219_vm3, %v539_v4 }
 0x3a1   :  { %1985 = vmatpush3.bf16.msra.mxu0 %v2188_v7  ;;  %1784 = vmatprep.mubr.msk.f32.mxu0 %vm2123_vm1, %v2124_v10 }
 0x3a2   :  { %1986 = vmatprep.subr.bf16.mxu0 %v2122_v3 }
 0x3a5   :  { %1988 = vmatpush3.bf16.msra.mxu0 %v2203_v12 }
 0x3a6   :  { %1989 = vmatprep.subr.bf16.mxu0 %v2122_v3 }
 0x3a8   :  { %1785 = vmatmul.mubr.msk.f32.vlgmr.msra.gmra.mrb[8].mxu0 %vm142_vm2, %v774_v6  ;;  %v1408_v6 = vld [vmem:[%s2459_s6 + $0x8] sm:$0xff] }
 0x3a9   :  { %1991 = vmatpush3.bf16.msra.mxu0 %v2225_v15  ;;  %1803 = vmatprep.mubr.msk.f32.mxu0 %vm2123_vm1, %v2124_v10 }
 0x3aa   :  { %1992 = vmatprep.subr.bf16.mxu0 %v2122_v3 }
 0x3ad   :  { %1994 = vmatpush3.bf16.msra.mxu0 %v2235_v18 }
 0x3ae   :  { %1995 = vmatprep.subr.bf16.mxu0 %v2122_v3 }
 0x3b1   :  { %1997 = vmatpush3.bf16.msra.mxu0 %v2244_v21 }
 0x3b2   :  { %1998 = vmatprep.subr.bf16.mxu0 %v2122_v3 }
 0x3b5   :  { %2000 = vmatpush3.bf16.msra.mxu0 %v2254_v24 }
 0x3b6   :  { %2019 = vmatprep.subr.bf16.mxu0 %v2122_v3 }
 0x473   :  { %v608_v8 = vpop.f32.mrb[6].mxu0 }
 0x474   :  { %v609_v9 = vadd.f32 %v2289_v35, %v608_v8  ;;  %v1745_v11 = vpop.f32.mrb[7].mxu0 }
 0x476   :  { %2078 = vtanh.f32 %v609_v9  ;;  %v1410_v9 = vld [vmem:[%s2459_s6 + $0x18] sm:$0xff] }
 0x47b   :  { %v843_v13 = vpop.f32.mrb[8].mxu0 }
 0x47c   :  { %v1786_v14 = vpop.f32.mrb[9].mxu0  ;;  %v847_v19 = vadd.f32 %v843_v13, %v2262_v27 }
 0x47e   :  { %2080 = vtanh.f32 %v847_v19  ;;  %v1526_v19 = vld [vmem:[%s2460_s7] ss:$0 sm:$0xff] }
 0x480   :  { %v2079_v16 = vpop.eup %2078 }
 0x481   :  { %v693_v17 = vrot.slane %v2079_v16, 2 }
 0x483   :  { %694 = vrot.lane.b32.xlu1 %v693_v17, %s2125_s14 }
 0x488   :  { %v2081_v25 = vpop.eup %2080 }
 0x4f5   :  { %v695_v20 = vpop.permute.xlu1 %694 }
 0x4f6   :  { %v697_v22 = vsel %vm142_vm2, %v2077_v5, %v695_v20 }
 0x4f7   :  { %v699_v23 = vrot.slane %v697_v22, 6 }
 0x4f9   :  { %1774 = vmatmul.mubr.msk.f32.vlgmr.msra.gmra.mrb[8].mxu1 %vm219_vm3, %v699_v23 }
 0x4fa   :  { %2003 = vmatpush3.bf16.msra.mxu1 %v2188_v7  ;;  %1814 = vmatprep.mubr.msk.f32.mxu1 %vm2123_vm1, %v2124_v10 }
 0x4fb   :  { %2004 = vmatprep.subr.bf16.mxu1 %v2122_v3 }
 0x4fe   :  { %2006 = vmatpush3.bf16.msra.mxu1 %v2203_v12 }
 0x4ff   :  { %2007 = vmatprep.subr.bf16.mxu1 %v2122_v3 }
 0x501   :  { %1815 = vmatmul.mubr.msk.f32.vlgmr.msra.gmra.mrb[10].mxu1 %vm142_vm2, %v2081_v25 }
 0x502   :  { %2009 = vmatpush3.bf16.msra.mxu1 %v2225_v15  ;;  %1833 = vmatprep.mubr.msk.f32.mxu1 %vm2123_vm1, %v2124_v10 }
 0x503   :  { %2010 = vmatprep.subr.bf16.mxu1 %v2122_v3 }
 0x506   :  { %2012 = vmatpush3.bf16.msra.mxu1 %v2235_v18 }
 0x507   :  { %2013 = vmatprep.subr.bf16.mxu1 %v2122_v3 }
 0x50a   :  { %2015 = vmatpush3.bf16.msra.mxu1 %v2244_v21 }
 0x50b   :  { %2016 = vmatprep.subr.bf16.mxu1 %v2122_v3 }
 0x50e   :  { %2018 = vmatpush3.bf16.msra.mxu1 %v2254_v24 }
 0x50f   :  { %2037 = vmatprep.subr.bf16.mxu1 %v2122_v3 }
 0x5cc   :  { %v768_v26 = vpop.f32.mrb[8].mxu1 }
 0x5cd   :  { %v769_v28 = vadd.f32 %v2289_v35, %v768_v26  ;;  %v1775_v29 = vpop.f32.mrb[9].mxu1 }
 0x5cf   :  { %2082 = vtanh.f32 %v769_v28 }
 0x5d4   :  { %v997_v30 = vpop.f32.mrb[10].mxu1 }
 0x5d5   :  { %v1816_v31 = vpop.f32.mrb[11].mxu1  ;;  %v1002_v33 = vrot.slane %v997_v30, 6 }
 0x5d7   :  { %v1004_v34 = vadd.f32 %v1002_v33, %v2262_v27 }
 0x5d9   :  { %v2083_v32 = vpop.eup %2082  ;;  %2084 = vtanh.f32 %v1004_v34 }
 0x5da   :  { %850 = vrot.lane.b32.xlu1 %v2083_v32, %s2125_s14 }
 0x5e3   :  { %v2085_v38 = vpop.eup %2084 }
 0x5e4   :  { %v1088_v39 = vrot.slane %v2085_v38, 2 }
 0x64c   :  { %v851_v36 = vpop.permute.xlu1 %850 }
 0x64d   :  { %v853_v37 = vsel %vm142_vm2, %v2081_v25, %v851_v36 }
 0x64e   :  { %1804 = vmatmul.mubr.msk.f32.vlgmr.msra.gmra.mrb[10].mxu0 %vm219_vm3, %v853_v37 }
 0x64f   :  { %2021 = vmatpush3.bf16.msra.mxu0 %v2188_v7  ;;  %1844 = vmatprep.mubr.msk.f32.mxu0 %vm2123_vm1, %v2124_v10 }
 0x650   :  { %2022 = vmatprep.subr.bf16.mxu0 %v2122_v3 }
 0x653   :  { %2024 = vmatpush3.bf16.msra.mxu0 %v2203_v12 }
 0x654   :  { %2025 = vmatprep.subr.bf16.mxu0 %v2122_v3 }
 0x656   :  { %1845 = vmatmul.mubr.msk.f32.vlgmr.msra.gmra.mrb[12].mxu0 %vm142_vm2, %v1088_v39 }
 0x657   :  { %2027 = vmatpush3.bf16.msra.mxu0 %v2225_v15  ;;  %1863 = vmatprep.mubr.msk.f32.mxu0 %vm2123_vm1, %v2124_v10 }
 0x658   :  { %2028 = vmatprep.subr.bf16.mxu0 %v2122_v3 }
 0x65b   :  { %2030 = vmatpush3.bf16.msra.mxu0 %v2235_v18 }
 0x65c   :  { %2031 = vmatprep.subr.bf16.mxu0 %v2122_v3 }
 0x65f   :  { %2033 = vmatpush3.bf16.msra.mxu0 %v2244_v21 }
 0x660   :  { %2034 = vmatprep.subr.bf16.mxu0 %v2122_v3 }
 0x663   :  { %2036 = vmatpush3.bf16.msra.mxu0 %v2254_v24 }
 0x664   :  { %2055 = vmatprep.subr.bf16.mxu0 %v2122_v3 }
 0x721   :  { %v923_v40 = vpop.f32.mrb[10].mxu0 }
 0x722   :  { %v924_v41 = vadd.f32 %v2289_v35, %v923_v40  ;;  %v1805_v42 = vpop.f32.mrb[11].mxu0 }
 0x724   :  { %2086 = vtanh.f32 %v924_v41 }
 0x729   :  { %v1157_v43 = vpop.f32.mrb[12].mxu0 }
 0x72a   :  { %v1846_v44 = vpop.f32.mrb[13].mxu0  ;;  %v1162_v47 = vrot.slane %v1157_v43, 4 }
 0x72c   :  { %v1164_v48 = vadd.f32 %v1162_v47, %v2262_v27 }
 0x72e   :  { %v2087_v45 = vpop.eup %2086  ;;  %2088 = vtanh.f32 %v1164_v48 }
 0x72f   :  { %v1007_v46 = vrot.slane %v2087_v45, 6 }
 0x731   :  { %1008 = vrot.lane.b32.xlu0 %v1007_v46, %s2125_s14 }
 0x738   :  { %v2089_v52 = vpop.eup %2088 }
 0x739   :  { %v1248_v53 = vrot.slane %v2089_v52, 4 }
 0x7a3   :  { %v1009_v49 = vpop.permute.xlu0 %1008 }
 0x7a4   :  { %v1011_v50 = vsel %vm142_vm2, %v2085_v38, %v1009_v49 }
 0x7a5   :  { %v1013_v51 = vrot.slane %v1011_v50, 2 }
 0x7a7   :  { %1834 = vmatmul.mubr.msk.f32.vlgmr.msra.gmra.mrb[12].mxu1 %vm219_vm3, %v1013_v51 }
 0x7a8   :  { %2039 = vmatpush3.bf16.msra.mxu1 %v2188_v7  ;;  %1874 = vmatprep.mubr.msk.f32.mxu1 %vm2123_vm1, %v2124_v10 }
 0x7a9   :  { %2040 = vmatprep.subr.bf16.mxu1 %v2122_v3 }
 0x7ac   :  { %2042 = vmatpush3.bf16.msra.mxu1 %v2203_v12 }
 0x7ad   :  { %2043 = vmatprep.subr.bf16.mxu1 %v2122_v3 }
 0x7af   :  { %1875 = vmatmul.mubr.msk.f32.vlgmr.msra.gmra.mrb[14].mxu1 %vm142_vm2, %v1248_v53 }
 0x7b0   :  { %2045 = vmatpush3.bf16.msra.mxu1 %v2225_v15  ;;  %1893 = vmatprep.mubr.msk.f32.mxu1 %vm2123_vm1, %v2124_v10 }
 0x7b1   :  { %2046 = vmatprep.subr.bf16.mxu1 %v2122_v3 }
 0x7b4   :  { %2048 = vmatpush3.bf16.msra.mxu1 %v2235_v18 }
 0x7b5   :  { %2049 = vmatprep.subr.bf16.mxu1 %v2122_v3 }
 0x7b8   :  { %2051 = vmatpush3.bf16.msra.mxu1 %v2244_v21 }
 0x7b9   :  { %2052 = vmatprep.subr.bf16.mxu1 %v2122_v3 }
 0x7bc   :  { %2054 = vmatpush3.bf16.msra.mxu1 %v2254_v24 }
 0x87a   :  { %v1082_v7 = vpop.f32.mrb[12].mxu1 }
 0x87b   :  { %v1083_v12 = vadd.f32 %v2289_v35, %v1082_v7  ;;  %v1835_v54 = vpop.f32.mrb[13].mxu1 }
 0x87d   :  { %2090 = vtanh.f32 %v1083_v12 }
 0x882   :  { %v1317_v15 = vpop.f32.mrb[14].mxu1 }
 0x883   :  { %v1876_v55 = vpop.f32.mrb[15].mxu1  ;;  %v1322_v63 = vrot.slane %v1317_v15, 2 }
 0x885   :  { %v1324_v0 = vadd.f32 %v1322_v63, %v2262_v27  ;;  %v1409_v27 = vld [vmem:[%s2459_s6 + $0x10] sm:$0xff] }
 0x886   :  { %v2059_v11 = vpack.c.bf16 %v1410_v9, %v1409_v27 }
 0x887   :  { %v2091_v56 = vpop.eup %2090 }
 0x888   :  { %v1167_v57 = vrot.slane %v2091_v56, 4 }
 0x88a   :  { %1168 = vrot.lane.b32.xlu1 %v1167_v57, %s2125_s14 }
 0x8fc   :  { %v1169_v18 = vpop.permute.xlu1 %1168 }
 0x8fd   :  { %v1171_v58 = vsel %vm142_vm2, %v2089_v52, %v1169_v18 }
 0x8fe   :  { %v1173_v59 = vrot.slane %v1171_v58, 4 }
 0x900   :  { %1864 = vmatmul.mubr.msk.f32.vlgmr.msra.gmra.mrb[14].mxu0 %vm219_vm3, %v1173_v59 }
 0x901   :  { %1904 = vmatprep.mubr.msk.f32.mxu0 %vm2123_vm1, %v2124_v10  ;;  %v1407_v10 = vld [vmem:[%s2459_s6] sm:$0xff]  ;;  %s2098_s6 = scalar_lea.vmem %s1500_s22, 32 }
 0x902   :  { %v2056_v8 = vpack.c.bf16 %v1408_v6, %v1407_v10  ;;  %p2099_p0 = scmp.ne.s32.totalorder %s1500_s22, %s2098_s6  ;;  %p2104_p2 = scmp.lt.s32.totalorder %s2098_s6, %s2098_s6 }
 0x904   :  { %2057 = vmatpush3.bf16.msra.mxu0 %v2056_v8  ;;  %p2105_p3 = por %p2104_p2, %p2103_p1 }
 0x905   :  { %2058 = vmatprep.subr.bf16.mxu0 %v2122_v3 }
 0x906   :  { %p2106_p4 = pnand %p2105_p3, %p2099_p0 }
 0x908   :  { %2060 = vmatpush3.bf16.msra.mxu0 %v2059_v11 }
 0x9d3   :  { %v1242_v21 = vpop.f32.mrb[14].mxu0 }
 0x9d4   :  { %v1243_v24 = vadd.f32 %v2289_v35, %v1242_v21  ;;  %v1865_v60 = vpop.f32.mrb[15].mxu0 }
 0x9d6   :  { %2092 = vtanh.f32 %v1243_v24 }
 0x9d7   :  { %2094 = vtanh.f32 %v1324_v0 }
 0x9e0   :  { %v2093_v61 = vpop.eup %2092 }
 0x9e1   :  { %v1327_v62 = vrot.slane %v2093_v61, 2  ;;  %v2095_v1 = vpop.eup %2094 }
 0x9e3   :  { %1328 = vrot.lane.b32.xlu0 %v1327_v62, %s2125_s14 }
 0xa55   :  { %v1329_v2 = vpop.permute.xlu0 %1328 }
 0xa56   :  { %v1331_v4 = vsel %vm142_vm2, %v2095_v1, %v1329_v2 }
 0xa57   :  { %v1333_v5 = vrot.slane %v1331_v4, 6 }
 0xa59   :  { %1894 = vmatmul.mubr.msk.f32.vlgmr.msra.gmra.mrb[16].mxu1 %vm219_vm3, %v1333_v5 }
 0xb2c   :  { %v1402_v13 = vpop.f32.mrb[16].mxu1 }
 0xb2d   :  { %v1403_v14 = vadd.f32 %v2289_v35, %v1402_v13  ;;  %v1895_v16 = vpop.f32.mrb[17].mxu1 }
 0xb2f   :  { %2096 = vtanh.f32 %v1403_v14 }
 0xb39   :  { %v2097_v17 = vpop.eup %2096 }
 0xb3a   :  { %1905 = vmatmul.mubr.msk.f32.vlgmr.msra.gmra.mrb[16].mxu0 %vm142_vm2, %v2097_v17 }
 0xc0d   :  { %v1487_v20 = vpop.f32.mrb[16].mxu0 }
 0xc0e   :  { %v1488_v22 = vadd.f32 %v1526_v19, %v1487_v20  ;;  %v1906_v23 = vpop.f32.mrb[17].mxu0 }
 0xc10   :  { %1492 = vst.msk [vmem:[#allocation2] sm:$0x3] %vm1491_vm4, %v1488_v22 }
 0xc11   :  { %2109 = shalt.err (!%p2106_p4)
}
 0xc12   :  { %s2110_s25 = scalar_lea.hbm %s2461_s8, 32 }
 0xc13   :  { %p2111_p5 = scmp.ne.s32.totalorder %s2461_s8, %s2110_s25  ;;  %p2114_p6 = scmp.lt.u32.totalorder %s2110_s25, %s2461_s8 }
 0xc15   :  { %p2116_p7 = pnand %p2114_p6, %p2111_p5 }
 0xc17   :  { %2119 = shalt.err (!%p2116_p7)
}
 0xc18   :  { %1502 = dma.vmem_to_hbm [thread:$0]  %s1500_s22, 32, %s2461_s8, [#allocation3]  }
 0xc19   :  { %2120 = dma.done.wait [#allocation3], 32  }
 0xc1a   :  { %2121 = vsyncadd [#allocation3], 4294967264 }
 0xc1b   :  { %1506 = vsyncpa [#allocation3], 1 }

</bundles_post_ra>
